<compile_context>
chip_gen: v5e
topology: v5e:2x2
jax: 0.10.0
libtpu: 0.0.40
codegen_flags: <defaults>
</compile_context>

<pallas_src>
import functools

import numpy as np
import jax
import jax.numpy as jnp
from jax.experimental import pallas as pl
from jax.experimental.pallas import tpu as pltpu

# Cosmological constants (same values as the PyTorch script).
Omega_Lambda = 0.685
Omega_m = 0.315
Omega_r = 5e-05
Omega_v0 = 0.01
tau_crackling = 1e-08 / 2.18e-18
tau_decay = 1e-09 / 2.18e-18

# Precomputed reciprocals so the kernel multiplies instead of dividing.
_INV_TAU_DECAY = 1.0 / tau_decay
_TWO_PI_OVER_TAU_CRACKLING = 2.0 * np.pi / tau_crackling


def _friedmann_kernel(in_ref, out_ref):
    # in_ref: (2, block_rows, 128) f32 — plane 0 = tau, plane 1 = a.
    tau = in_ref[0]
    a = in_ref[1]

    # Decaying vacuum component (multiply by precomputed 1/tau_decay).
    omega_v = Omega_v0 * jnp.exp(-tau * _INV_TAU_DECAY)

    # "Crackling" perturbation, active only while tau < tau_crackling.
    # The torch code uses a python `if`; tau is per-lane data here, so the
    # same semantics are expressed with a select.
    pert = jnp.where(
        tau < tau_crackling,
        0.1 * jnp.abs(jnp.sin(tau * _TWO_PI_OVER_TAU_CRACKLING)),
        jnp.zeros_like(tau),
    )

    # One reciprocal + multiplies instead of two divides (EUP slot relief).
    inv_a = pl.reciprocal(a)          # exact (approx=False)
    inv_a2 = inv_a * inv_a
    inv_a4 = inv_a2 * inv_a2

    h_sq = (Omega_m * a * inv_a4      # = Omega_m / a^3
            + Omega_r * inv_a4        # = Omega_r / a^4
            + Omega_Lambda
            + omega_v
            + pert)
    h_sq = jnp.maximum(h_sq, 1e-10)   # torch.clamp(min=1e-10)

    out_ref[...] = a * jnp.sqrt(h_sq)


def _rhs_pallas(packed, *, block_rows):
    """packed: (2, rows, 128) f32, rows % block_rows == 0, block_rows % 8 == 0."""
    _, rows, cols = packed.shape
    grid = (rows // block_rows,)
    return pl.pallas_call(
        _friedmann_kernel,
        out_shape=jax.ShapeDtypeStruct((rows, cols), jnp.float32),
        grid_spec=pltpu.PrefetchScalarGridSpec(
            num_scalar_prefetch=0,
            grid=grid,
            in_specs=[pl.BlockSpec((2, block_rows, cols), lambda i: (0, i, 0))],
            out_specs=pl.BlockSpec((block_rows, cols), lambda i: (i, 0)),
        ),
        compiler_params=pltpu.CompilerParams(
            dimension_semantics=("parallel",)),
    )(packed)


@jax.jit
def friedmann_ode(tau, y):
    """JAX/Pallas equivalent of FriedmannODE.forward(tau, y).

    tau: scalar (python float or 0-d array)
    y:   1-D array; only y[0] is used
    returns: shape (1,) float32 array [da_dtau]
    """
    tau_f = jnp.asarray(tau, jnp.float32)
    a_f = jnp.asarray(y, jnp.float32)[0]
    # Broadcast the scalar pair across one minimal (8,128) tile so every lane
    # holds valid data (no inf/nan from padding); one grid step total.
    packed = jnp.stack([
        jnp.full((8, 128), tau_f, jnp.float32),
        jnp.full((8, 128), a_f, jnp.float32),
    ])
    out = _rhs_pallas(packed, block_rows=8)
    return out[0, 0].reshape(1)


@functools.partial(jax.jit, static_argnames=("block_rows",))
def friedmann_rhs_batched(tau_grid, a_grid, *, block_rows=128):
    """Batched RHS: elementwise da/dtau for arrays of (tau, a) pairs.

    tau_grid, a_grid: (rows, 128) float32, rows % block_rows == 0.
    returns: (rows, 128) float32.
    """
    tau_grid = jnp.asarray(tau_grid, jnp.float32)
    a_grid = jnp.asarray(a_grid, jnp.float32)
    packed = jnp.stack([tau_grid, a_grid])          # (2, rows, 128)
    return _rhs_pallas(packed, block_rows=block_rows)


def _reference_batched(tau, a):
    """Pure-JAX reference (mirrors the torch math, f32)."""
    tau = jnp.asarray(tau, jnp.float32)
    a = jnp.asarray(a, jnp.float32)
    omega_v = Omega_v0 * jnp.exp(-tau / tau_decay)
    pert = jnp.where(
        tau < tau_crackling,
        0.1 * jnp.abs(jnp.sin(2.0 * np.pi * tau / tau_crackling)),
        0.0,
    )
    h_sq = Omega_m / a ** 3 + Omega_r / a ** 4 + Omega_Lambda + omega_v + pert
    h_sq = jnp.maximum(h_sq, 1e-10)
    return a * jnp.sqrt(h_sq)


def _reference_single(tau, y):
    tau = jnp.asarray(tau, jnp.float32)
    a = jnp.asarray(y, jnp.float32)[0]
    return jnp.reshape(_reference_batched(tau, a), (1,))


if __name__ == "__main__":
    key = jax.random.PRNGKey(0)
    k_tau, k_a, k_tg, k_ag = jax.random.split(key, 4)

    # --- single (tau, a) forward, matching the torch module's signature ---
    tau = jax.random.uniform(k_tau, (), jnp.float32,
                             minval=0.0, maxval=0.5 * tau_crackling)
    y = jax.random.uniform(k_a, (1,), jnp.float32, minval=0.5, maxval=1.5)

    out = friedmann_ode(tau, y)
    jax.block_until_ready(out)
    ref = _reference_single(tau, y)
    assert out.shape == (1,)
    np.testing.assert_allclose(np.asarray(out), np.asarray(ref),
                               rtol=1e-5, atol=1e-6)

    # Exercise the tau >= tau_crackling branch once.
    tau_late = jnp.float32(2.0 * tau_crackling)
    out2 = friedmann_ode(tau_late, y)
    jax.block_until_ready(out2)
    ref2 = _reference_single(tau_late, y)
    np.testing.assert_allclose(np.asarray(out2), np.asarray(ref2),
                               rtol=1e-5, atol=1e-6)

    # --- batched ensemble of (tau, a) pairs: the performance-oriented path ---
    rows, cols = 256, 128
    tau_grid = jax.random.uniform(k_tg, (rows, cols), jnp.float32,
                                  minval=0.0, maxval=2.0 * tau_crackling)
    a_grid = jax.random.uniform(k_ag, (rows, cols), jnp.float32,
                                minval=0.3, maxval=2.0)
    out_b = friedmann_rhs_batched(tau_grid, a_grid, block_rows=128)
    jax.block_until_ready(out_b)
    ref_b = _reference_batched(tau_grid, a_grid)
    np.testing.assert_allclose(np.asarray(out_b), np.asarray(ref_b),
                               rtol=1e-5, atol=1e-6)

    print("KERNEL_OK")
</pallas_src>

<mosaic_0001>
module attributes {stable_mosaic.version = 11 : i64} {
  func.func @_friedmann_kernel(%arg0: i32, %arg1: memref<2x8x128xf32, #tpu.memory_space<vmem>>, %arg2: memref<8x128xf32, #tpu.memory_space<vmem>>) attributes {dimension_semantics = [#tpu.dimension_semantics<parallel>], iteration_bounds = array<i64: 1>, scalar_prefetch = 0 : i64, scratch_operands = 0 : i64, tpu.core_type = #tpu.core_type<tc>, window_params = [{transform_indices = @transform_0, window_bounds = array<i64: 2, 8, 128>}, {transform_indices = @transform_1, window_bounds = array<i64: 8, 128>}]} {
    %c0 = arith.constant 0 : index
    %c0_0 = arith.constant 0 : index
    %c0_1 = arith.constant 0 : index
    %0 = vector.load %arg1[%c0, %c0_0, %c0_1] : memref<2x8x128xf32, #tpu.memory_space<vmem>>, vector<1x8x128xf32>
    %1 = vector.shape_cast %0 : vector<1x8x128xf32> to vector<8x128xf32>
    %c1 = arith.constant 1 : index
    %c0_2 = arith.constant 0 : index
    %c0_3 = arith.constant 0 : index
    %2 = vector.load %arg1[%c1, %c0_2, %c0_3] : memref<2x8x128xf32, #tpu.memory_space<vmem>>, vector<1x8x128xf32>
    %3 = vector.shape_cast %2 : vector<1x8x128xf32> to vector<8x128xf32>
    %cst = arith.constant 0.000000e+00 : f32
    %4 = vector.broadcast %cst : f32 to vector<8x128xf32>
    %5 = arith.subf %4, %1 : vector<8x128xf32>
    %cst_4 = arith.constant 2.180000e-09 : f32
    %6 = vector.broadcast %cst_4 : f32 to vector<8x128xf32>
    %7 = arith.mulf %5, %6 : vector<8x128xf32>
    %8 = math.exp %7 : vector<8x128xf32>
    %cst_5 = arith.constant 0.00999999977 : f32
    %9 = vector.broadcast %cst_5 : f32 to vector<8x128xf32>
    %10 = arith.mulf %9, %8 : vector<8x128xf32>
    %cst_6 = arith.constant 4.58715597E+9 : f32
    %11 = vector.broadcast %cst_6 : f32 to vector<8x128xf32>
    %12 = arith.cmpf olt, %1, %11 : vector<8x128xf32>
    %cst_7 = arith.constant 1.36973444E-9 : f32
    %13 = vector.broadcast %cst_7 : f32 to vector<8x128xf32>
    %14 = arith.mulf %1, %13 : vector<8x128xf32>
    %15 = math.sin %14 : vector<8x128xf32>
    %16 = math.absf %15 : vector<8x128xf32>
    %cst_8 = arith.constant 1.000000e-01 : f32
    %17 = vector.broadcast %cst_8 : f32 to vector<8x128xf32>
    %18 = arith.mulf %17, %16 : vector<8x128xf32>
    %cst_9 = arith.constant 0.000000e+00 : f32
    %19 = vector.broadcast %cst_9 : f32 to vector<8x128xf32>
    %20 = arith.select %12, %18, %19 : vector<8x128xi1>, vector<8x128xf32>
    %21 = tpu.reciprocal %3 : vector<8x128xf32> -> vector<8x128xf32>
    %22 = arith.mulf %21, %21 : vector<8x128xf32>
    %23 = arith.mulf %22, %22 : vector<8x128xf32>
    %cst_10 = arith.constant 3.150000e-01 : f32
    %24 = vector.broadcast %cst_10 : f32 to vector<8x128xf32>
    %25 = arith.mulf %24, %3 : vector<8x128xf32>
    %26 = arith.mulf %25, %23 : vector<8x128xf32>
    %cst_11 = arith.constant 5.000000e-05 : f32
    %27 = vector.broadcast %cst_11 : f32 to vector<8x128xf32>
    %28 = arith.mulf %27, %23 : vector<8x128xf32>
    %29 = arith.addf %26, %28 : vector<8x128xf32>
    %cst_12 = arith.constant 6.850000e-01 : f32
    %30 = vector.broadcast %cst_12 : f32 to vector<8x128xf32>
    %31 = arith.addf %29, %30 : vector<8x128xf32>
    %32 = arith.addf %31, %10 : vector<8x128xf32>
    %33 = arith.addf %32, %20 : vector<8x128xf32>
    %cst_13 = arith.constant 1.000000e-10 : f32
    %34 = vector.broadcast %cst_13 : f32 to vector<8x128xf32>
    %35 = arith.maximumf %33, %34 : vector<8x128xf32>
    %36 = math.sqrt %35 : vector<8x128xf32>
    %37 = arith.mulf %3, %36 : vector<8x128xf32>
    %c0_14 = arith.constant 0 : index
    %c0_15 = arith.constant 0 : index
    %38 = vector.load %arg2[%c0_14, %c0_15] : memref<8x128xf32, #tpu.memory_space<vmem>>, vector<8x128xf32>
    tpu.vector_store %arg2[%c0_14, %c0_15], %37 {strides = array<i32>} : memref<8x128xf32, #tpu.memory_space<vmem>>, vector<8x128xf32>,
    return
  }
  func.func @transform_0(%arg0: i32) -> (i32, i32, i32) {
    %c0_i32 = arith.constant 0 : i32
    %c0_i32_0 = arith.constant 0 : i32
    %c0_i32_1 = arith.constant 0 : i32
    return %c0_i32, %arg0, %c0_i32_0 : i32, i32, i32
  }
  func.func @transform_1(%arg0: i32) -> (i32, i32) {
    %c0_i32 = arith.constant 0 : i32
    %c0_i32_0 = arith.constant 0 : i32
    return %arg0, %c0_i32 : i32, i32
  }
}

</mosaic_0001>

<bundles_post_ra>
// kernel: friedmann_ode.1
= control target key start
LH: loop header
LB: loop body
LE: loop exit
PB: predicated region body
PF: predicated region fallthrough
CT: control target
= control target key end

     0   :  { %v235_v13 = vmov 683565275   ;;  %v236_v15 = vmov 2475754826   ;;  %v237_v17 = vmov 2131351028   ;;  %s321_s0 = inlined_call_operand.vmem [shape: f32[2,8,128], index: 0, kind: input, shape index: {}]   ;;  %s322_s1 = inlined_call_operand.vmem [shape: f32[8,128], index: 1, kind: output, shape index: {}]  }
   0x1   :  { %v255_v0 = vld [vmem:[%s321_s0] sm:$0xff]  ;;  %v238_v19 = vmov 2102212464   ;;  %v239_v21 = vmov 920167782  }
   0x2   :  { %v258_v1 = vmul.f32 1.3697344e-09, %v255_v0  ;;  %v240_v27 = vmov 1326507024  }
   0x4   :  { %v21_v2 = vand.u32 2139095040, %v258_v1  ;;  %v18_v4 = vand.u32 2147483647, %v258_v1 }
   0x6   :  { %v22_v3 = vshrl.u32 %v21_v2, 23  ;;  %v25_v7 = vand.u32 8388607, %v18_v4 }
   0x8   :  { %v219_v5 = vadd.s32 4294967169, %v22_v3  ;;  %v26_v10 = vor.u32 8388608, %v25_v7  ;;  %v241_v3 = vmov 0  }
   0xa   :  { %v28_v6 = vadd.s32 1, %v219_v5  ;;  %v267_v29 = vshll.u32 %v26_v10, 8 }
   0xc   :  { %vm29_vm0 = vcmp.gt.s32.totalorder %v28_v6, 0  ;;  %v67_v41 = vand.u32 65535, %v267_v29  ;;  %v68_v42 = vshrl.u32 %v267_v29, 16 }
   0xd   :  { %v30_v8 = vsel %vm29_vm0, %v28_v6, 0  ;;  %vm20_vm0 = vcmp.lt.s32.totalorder %v258_v1, 0 }
   0xe   :  { %v32_v9 = vand.u32 31, %v30_v8  ;;  %v264_v11 = vshrl.u32 %v30_v8, 5 }
  0x10   :  { %v33_v12 = vsub.s32 32, %v32_v9  ;;  %v35_v14 = vshll.u32 %v235_v13, %v32_v9  ;;  %v38_v16 = vshll.u32 %v236_v15, %v32_v9  ;;  %v41_v18 = vshll.u32 %v237_v17, %v32_v9 }
  0x11   :  { %v44_v20 = vshll.u32 %v238_v19, %v32_v9  ;;  %v47_v22 = vshll.u32 %v239_v21, %v32_v9  ;;  %vm50_vm1 = vcmp.lt.s32.totalorder %v264_v11, 1  ;;  %vm53_vm2 = vcmp.lt.s32.totalorder %v264_v11, 4 }
  0x12   :  { %v36_v23 = vshrl.u32 %v236_v15, %v33_v12  ;;  %v39_v24 = vshrl.u32 %v237_v17, %v33_v12  ;;  %v42_v25 = vshrl.u32 %v238_v19, %v33_v12  ;;  %v45_v26 = vshrl.u32 %v239_v21, %v33_v12 }
  0x13   :  { %v48_v28 = vshrl.u32 %v240_v27, %v33_v12  ;;  %vm52_vm3 = vcmp.lt.s32.totalorder %v264_v11, 3  ;;  %vm51_vm4 = vcmp.lt.s32.totalorder %v264_v11, 2  ;;  %v34_v49 = vshrl.u32 %v235_v13, %v33_v12  ;;  %v302_v27 = vld [vmem:[%s321_s0 + $0x8] sm:$0xff] }
  0x14   :  { %v37_v30 = vor.u32 %v36_v23, %v35_v14  ;;  %v40_v31 = vor.u32 %v39_v24, %v38_v16  ;;  %v43_v32 = vor.u32 %v42_v25, %v41_v18  ;;  %v46_v33 = vor.u32 %v45_v26, %v44_v20 }
  0x15   :  { %v49_v34 = vor.u32 %v48_v28, %v47_v22  ;;  %229 = vrcp.f32 %v302_v27  ;;  %v11_v11 = vsub.f32 0.0, %v255_v0  ;;  %vm181_vm11 = vweird.f32 %v302_v27 }
  0x16   :  { %v58_v35 = vsel %vm50_vm1, %v37_v30, %v40_v31  ;;  %v62_v36 = vsel %vm50_vm1, %v40_v31, %v43_v32  ;;  %v59_v37 = vsel %vm53_vm2, %v46_v33, 920167782  ;;  %v54_v62 = vsel %vm50_vm1, %v34_v49, %v37_v30 }
  0x17   :  { %v63_v38 = vsel %vm53_vm2, %v49_v34, 1326507024  ;;  %v60_v39 = vsel %vm52_vm3, %v43_v32, %v59_v37  ;;  %v55_v2 = vsel %vm53_vm2, %v43_v32, 2102212464  ;;  %vm19_vm1 = vcmp.le.f32.partialorder %v18_v4, 0.7853982 }
  0x18   :  { %v64_v40 = vsel %vm52_vm3, %v46_v33, %v63_v38  ;;  %v61_v43 = vsel %vm51_vm4, %v58_v35, %v60_v39  ;;  %v56_v14 = vsel %vm52_vm3, %v40_v31, %v55_v2 }
  0x19   :  { %v65_v44 = vsel %vm51_vm4, %v62_v36, %v64_v40  ;;  %v91_v47 = vand.u32 65535, %v61_v43  ;;  %v92_v48 = vshrl.u32 %v61_v43, 16  ;;  %v57_v22 = vsel %vm51_vm4, %v54_v62, %v56_v14 }
  0x1a   :  { %v69_v45 = vand.u32 65535, %v65_v44  ;;  %v70_v46 = vshrl.u32 %v65_v44, 16  ;;  %v111_v26 = vmul.u32 %v267_v29, %v57_v22  ;;  %v12_v36 = vmul.f32 2.18e-09, %v11_v11 }
  0x1b   :  { %v93_v53 = vmul.u32 %v91_v47, %v67_v41  ;;  %v94_v54 = vmul.u32 %v92_v48, %v67_v41  ;;  %v95_v55 = vmul.u32 %v91_v47, %v68_v42  ;;  %v96_v59 = vmul.u32 %v92_v48, %v68_v42  ;;  %v230_v34 = vpop.eup %229 }
  0x1c   :  { %v71_v50 = vmul.u32 %v69_v45, %v67_v41  ;;  %v72_v51 = vmul.u32 %v70_v46, %v67_v41  ;;  %v73_v52 = vmul.u32 %v69_v45, %v68_v42  ;;  %v74_v56 = vmul.u32 %v70_v46, %v68_v42 }
  0x1d   :  { %v97_v60 = vshll.u32 %v94_v54, 16  ;;  %v99_v61 = vshll.u32 %v95_v55, 16  ;;  %v98_v12 = vshrl.u32 %v94_v54, 16  ;;  %v100_v18 = vshrl.u32 %v95_v55, 16 }
  0x1e   :  { %v75_v57 = vshll.u32 %v72_v51, 16  ;;  %v77_v58 = vshll.u32 %v73_v52, 16  ;;  %v76_v7 = vshrl.u32 %v72_v51, 16  ;;  %v78_v15 = vshrl.u32 %v73_v52, 16 }
  0x1f   :  { %vm101_vm6 = vc.u32 %v93_v53, %v97_v60  ;;  %v103_v6 = vadd.s32 %v97_v60, %v93_v53  ;;  %v177_v29 = vmul.f32 %v230_v34, %v302_v27  ;;  %v13_v40 = vmul.f32 1.442695, %v12_v36 }
  0x20   :  { %vm79_vm5 = vc.u32 %v71_v50, %v75_v57  ;;  %v81_v63 = vadd.s32 %v75_v57, %v71_v50  ;;  %v102_v9 = vsel %vm101_vm6, 1, %v241_v3  ;;  %v187_v43 = vand.u32 2147483648, %v302_v27 }
  0x21   :  { %v80_v5 = vsel %vm79_vm5, 1, %v241_v3  ;;  %v104_v13 = vadd.s32 %v102_v9, %v96_v59  ;;  %vm105_vm8 = vc.u32 %v103_v6, %v99_v61  ;;  %v107_v21 = vadd.s32 %v103_v6, %v99_v61 }
  0x22   :  { %v82_v8 = vadd.s32 %v80_v5, %v74_v56  ;;  %vm83_vm7 = vc.u32 %v81_v63, %v77_v58  ;;  %v106_v17 = vsel %vm105_vm8, 1, %v241_v3  ;;  %v178_v38 = vsub.f32 1.0, %v177_v29 }
  0x23   :  { %v84_v10 = vsel %vm83_vm7, 1, %v241_v3  ;;  %v108_v19 = vadd.s32 %v106_v17, %v104_v13  ;;  %vm182_vm12 = vweird.f32 %v230_v34  ;;  %v185_v46 = vand.u32 2147483647, %v302_v27 }
  0x24   :  { %v86_v16 = vadd.s32 %v84_v10, %v82_v8  ;;  %v179_v41 = vmul.f32 %v230_v34, %v178_v38  ;;  %vm183_vm13 = vmor %vm181_vm11, %vm182_vm12  ;;  %v188_v47 = vor.u32 1.1754944e-38, %v187_v43  ;;  %231 = vpow2.f32 %v13_v40 }
  0x25   :  { %v109_v23 = vadd.s32 %v108_v19, %v98_v12  ;;  %vm186_vm14 = vcmp.eq.f32.partialorder %v185_v46, 8.507059e+37  ;;  %v192_v57 = vmul.f32 0.315, %v302_v27  ;;  %vm161_vm5 = vweird.f32 %v258_v1 }
  0x26   :  { %v87_v20 = vadd.s32 %v86_v16, %v76_v7  ;;  %v180_v45 = vadd.f32 %v230_v34, %v179_v41  ;;  %vm16_vm6 = vcmp.lt.f32.partialorder %v255_v0, 4.587156e+09 }
  0x27   :  { %v110_v25 = vadd.s32 %v109_v23, %v100_v18 }
  0x28   :  { %v88_v24 = vadd.s32 %v87_v20, %v78_v15  ;;  %v184_v49 = vsel %vm183_vm13, %v230_v34, %v180_v45 }
  0x29   :  { %v114_v28 = vadd.s32 1, %v110_v25  ;;  %v189_v51 = vsel %vm186_vm14, %v188_v47, %v184_v49 }
  0x2a   :  { %vm113_vm9 = vc.u32 %v88_v24, %v107_v21  ;;  %v112_v50 = vadd.s32 %v107_v21, %v88_v24  ;;  %v190_v53 = vmul.f32 %v189_v51, %v189_v51  ;;  %v232_v59 = vpop.eup %231 }
  0x2b   :  { %v115_v30 = vsel %vm113_vm9, %v114_v28, %v110_v25  ;;  %v15_v5 = vmul.f32 0.01, %v232_v59 }
  0x2c   :  { %v116_v31 = vadd.s32 %v115_v30, %v111_v26  ;;  %v191_v58 = vmul.f32 %v190_v53, %v190_v53 }
  0x2e   :  { %v117_v32 = vadd.s32 536870912, %v116_v31  ;;  %v193_v62 = vmul.f32 %v192_v57, %v191_v58  ;;  %v194_v63 = vmul.f32 5e-05, %v191_v58 }
  0x30   :  { %v118_v33 = vshrl.u32 %v117_v32, 30  ;;  %v195_v6 = vadd.f32 %v194_v63, %v193_v62 }
  0x32   :  { %v119_v35 = vshll.u32 %v118_v33, 30  ;;  %v196_v9 = vadd.f32 0.685, %v195_v6  ;;  %v142_v14 = vsub.s32 4, %v118_v33 }
  0x34   :  { %v120_v37 = vsub.s32 %v116_v31, %v119_v35  ;;  %v197_v12 = vadd.f32 %v196_v9, %v15_v5  ;;  %v143_v17 = vsel %vm20_vm0, %v142_v14, %v118_v33 }
  0x35   :  { %v145_v20 = vsel %vm19_vm1, 0, %v143_v17 }
  0x36   :  { %vm121_vm10 = vcmp.lt.s32.totalorder %v120_v37, 0  ;;  %v122_v39 = vsub.s32 0, %v120_v37  ;;  %v162_v25 = vadd.s32 3, %v145_v20 }
  0x38   :  { %v123_v42 = vsel %vm121_vm10, %v122_v39, %v120_v37  ;;  %v163_v32 = vand.u32 3, %v162_v25 }
  0x39   :  { %v124_v44 = vclz %v123_v42 }
  0x3a   :  { %vm168_vm2 = vcmp.eq.s32.totalorder %v163_v32, 2  ;;  %vm165_vm3 = vcmp.eq.s32.totalorder %v163_v32, 0  ;;  %vm164_vm4 = vcmp.lt.s32.totalorder %v163_v32, 2 }
  0x3b   :  { %v220_v48 = vadd.s32 4294967294, %v124_v44 }
  0x3d   :  { %vm221_vm15 = vcmp.lt.s32.totalorder %v220_v48, 0 }
  0x3e   :  { %v127_v52 = vsel %vm221_vm15, 0, %v220_v48 }
  0x3f   :  { %v128_v54 = vsub.s32 32, %v127_v52  ;;  %v129_v55 = vshll.u32 %v120_v37, %v127_v52  ;;  %v132_v56 = vsub.s32 4294967266, %v127_v52 }
  0x41   :  { %v130_v60 = vshrl.u32 %v112_v50, %v128_v54  ;;  %v133_v61 = vadd.s32 127, %v132_v56 }
  0x43   :  { %v131_v2 = vor.u32 %v130_v60, %v129_v55  ;;  %v134_v3 = vshll.u32 %v133_v61, 23 }
  0x45   :  { %v135_v7 = vor.u32 4788187, %v134_v3  ;;  %v138_v8 = vcvt.s32.f32 %v131_v2 }
  0x47   :  { %v136_v10 = vand.u32 2147483647, %v135_v7 }
  0x49   :  { %v139_v13 = vmul.f32 %v138_v8, %v136_v10 }
  0x4b   :  { %v140_v15 = vxor.u32 2147483648, %v139_v13 }
  0x4d   :  { %v141_v16 = vsel %vm20_vm0, %v140_v15, %v139_v13 }
  0x4e   :  { %v144_v18 = vsel %vm19_vm1, %v258_v1, %v141_v16 }
  0x4f   :  { %v146_v19 = vmul.f32 %v144_v18, %v144_v18 }
  0x51   :  { %v147_v21 = vmul.f32 -0.001358992, %v146_v19  ;;  %v154_v22 = vmul.f32 -0.00019511016, %v146_v19 }
  0x53   :  { %v148_v23 = vadd.f32 0.041655596, %v147_v21  ;;  %v155_v24 = vadd.f32 0.008332121, %v154_v22 }
  0x55   :  { %v149_v26 = vmul.f32 %v148_v23, %v146_v19  ;;  %v156_v28 = vmul.f32 %v155_v24, %v146_v19 }
  0x57   :  { %v150_v30 = vadd.f32 -0.4999988, %v149_v26  ;;  %v157_v31 = vadd.f32 -0.16666654, %v156_v28 }
  0x59   :  { %v151_v11 = vmul.f32 %v150_v30, %v146_v19  ;;  %v158_v34 = vmul.f32 %v157_v31, %v146_v19 }
  0x5b   :  { %v152_v4 = vadd.f32 1.0, %v151_v11  ;;  %v159_v35 = vadd.f32 1.0, %v158_v34 }
  0x5d   :  { %v160_v33 = vmul.f32 %v159_v35, %v144_v18  ;;  %v169_v36 = vxor.u32 2147483648, %v152_v4 }
  0x5f   :  { %v166_v29 = vxor.u32 2147483648, %v160_v33  ;;  %v170_v37 = vsel %vm168_vm2, %v169_v36, %v160_v33 }
  0x61   :  { %v167_v38 = vsel %vm165_vm3, %v152_v4, %v166_v29 }
  0x62   :  { %v171_v39 = vsel %vm164_vm4, %v167_v38, %v170_v37 }
  0x63   :  { %v172_v40 = vsel %vm161_vm5, nan, %v171_v39 }
  0x64   :  { %v173_v41 = vand.u32 2147483647, %v172_v40 }
  0x66   :  { %v174_v42 = vmul.f32 0.1, %v173_v41 }
  0x68   :  { %v175_v43 = vsel %vm16_vm6, %v174_v42, 0.0 }
  0x69   :  { %v198_v44 = vadd.f32 %v197_v12, %v175_v43 }
  0x6b   :  { %v199_v45 = vmax.f32 %v198_v44, 1e-10 }
  0x6d   :  { %233 = vrsqrt.f32 %v199_v45  ;;  %vm207_vm7 = vcmp.eq.f32.partialorder %v199_v45, inf  ;;  %v210_v52 = vand.u32 2147483648, %v199_v45  ;;  %vm209_vm8 = vcmp.eq.f32.partialorder %v199_v45, 0.0 }
  0x73   :  { %v234_v46 = vpop.eup %233 }
  0x74   :  { %v201_v47 = vmul.f32 %v234_v46, %v199_v45 }
  0x76   :  { %v202_v48 = vmul.f32 %v234_v46, %v201_v47 }
  0x78   :  { %v203_v49 = vmul.f32 0.5, %v202_v48 }
  0x7a   :  { %v204_v50 = vsub.f32 1.5, %v203_v49 }
  0x7c   :  { %v205_v51 = vmul.f32 %v234_v46, %v204_v50 }
  0x7e   :  { %v206_v1 = vmul.f32 %v205_v51, %v199_v45 }
  0x80   :  { %v208_v53 = vsel %vm207_vm7, %v199_v45, %v206_v1 }
  0x81   :  { %v211_v54 = vsel %vm209_vm8, %v210_v52, %v208_v53 }
  0x82   :  { %v212_v55 = vmul.f32 %v302_v27, %v211_v54 }
  0x84   :  { %213 = vst [vmem:[%s322_s1] sm:$0xff] %v212_v55 }

</bundles_post_ra>
